<compile_context>
chip_gen: v5e
topology: v5e:2x2
jax: 0.10.0
libtpu: 0.0.40
codegen_flags: <defaults>
</compile_context>

<pallas_src>
import jax
import jax.numpy as jnp
from jax.experimental import pallas as pl
from jax.experimental.pallas import tpu as pltpu


def _broadcast_kernel(pos_ref, out_ref):
    # pos_ref: (1, NF) VMEM tile, resident across all grid steps (constant index_map).
    # out_ref: (Bt, NF) lane-dense output slab for the current batch block.
    # jnp.broadcast_to lowers to a sublane broadcast + full-lane vst; the op is
    # output-DMA bound, so this is fully hidden under the writeback.
    out_ref[...] = jnp.broadcast_to(pos_ref[...], out_ref.shape)


# VMEM sizing constants (bytes).
_VMEM_HEADROOM = 2 << 20        # compiler-internal scratch headroom
_VMEM_LIMIT_FLOOR = 16 << 20    # never ask for less than the v5e scoped default
_VMEM_LIMIT_CAP = 48 << 20      # safe under v7x's 64 MiB physical VMEM
_SMALL_FASTPATH_BYTES = 256 << 10   # below this, Pallas launch overhead dominates
_TC_SPLIT_BYTES = 4 << 20       # split batch across >=2 grid steps above this size


def poslearned_forward(pos_embedding: jax.Array, batch: int,
                       *, vmem_block_bytes: int = 8 << 20,
                       force_pallas: bool = False) -> jax.Array:
    """pos_embedding: (1, N, F) -> returns (batch, N, F), matching the PyTorch module."""
    assert pos_embedding.ndim == 3 and pos_embedding.shape[0] == 1
    _, n, f = pos_embedding.shape
    nf = n * f
    itemsize = jnp.dtype(pos_embedding.dtype).itemsize
    row_bytes = nf * itemsize
    out_bytes = batch * row_bytes

    # ---- fallback / fast paths -------------------------------------------------
    # Non-128-multiple last dim would force masked vst.msk tails -> let XLA handle it.
    # Tiny outputs: the copy is cheaper than the pallas_call launch overhead.
    if (nf % 128 != 0) or (not force_pallas and out_bytes < _SMALL_FASTPATH_BYTES):
        return jnp.broadcast_to(pos_embedding, (batch, n, f))

    # ---- block sizing -----------------------------------------------------------
    # Cap the per-block budget so 2*block (double-buffered output) + input + headroom
    # stays under the 48 MiB ceiling (safe on v7x's 64 MiB physical VMEM).
    max_block_bytes = (_VMEM_LIMIT_CAP - _VMEM_HEADROOM - 2 * row_bytes) // 2
    block_bytes = max(row_bytes, min(vmem_block_bytes, max_block_bytes))

    target_rows = max(1, block_bytes // row_bytes)
    if target_rows >= batch:
        bt = batch  # single block covering the whole batch (full-dim block is legal)
        # v7x: ensure >=2 grid steps for large outputs so the "parallel" axis spans
        # both TensorCores (each gets its own output-DMA stream).  Only when the
        # split block can stay 8-row aligned.
        if batch >= 16 and out_bytes >= _TC_SPLIT_BYTES:
            half = -(-batch // 2)                 # cdiv(batch, 2)
            bt_split = ((half + 7) // 8) * 8      # round up to sublane multiple
            if bt_split < batch:
                bt = bt_split
    else:
        # Sublane-aligned block height.  If even 8 rows exceed the budget we still
        # take 8 (minimum aligned block) and size the VMEM limit from the actual bt.
        bt = max(8, (target_rows // 8) * 8)
        bt = min(bt, batch)

    num_steps = pl.cdiv(batch, bt)

    # Explicit VMEM limit sized from the *actual* block: double-buffered output +
    # double-buffered (resident) input row + headroom.
    vmem_limit = 2 * bt * row_bytes + 2 * row_bytes + _VMEM_HEADROOM
    vmem_limit = int(min(max(vmem_limit, _VMEM_LIMIT_FLOOR), _VMEM_LIMIT_CAP))

    # Flatten to a lane-dense (1, N*F) layout outside the kernel (free reshape).
    pos_flat = pos_embedding.reshape(1, nf)

    out_flat = pl.pallas_call(
        _broadcast_kernel,
        out_shape=jax.ShapeDtypeStruct((batch, nf), pos_embedding.dtype),
        grid_spec=pltpu.PrefetchScalarGridSpec(
            num_scalar_prefetch=0,
            grid=(num_steps,),
            in_specs=[pl.BlockSpec((1, nf), lambda b: (0, 0))],   # resident, no re-DMA
            out_specs=pl.BlockSpec((bt, nf), lambda b: (b, 0)),   # lane-dense big blocks
        ),
        compiler_params=pltpu.CompilerParams(
            dimension_semantics=("parallel",),       # shards batch blocks across TCs
            vmem_limit_bytes=vmem_limit,             # explicit: v5e default is only 16 MiB
        ),
        cost_estimate=pl.CostEstimate(
            flops=0, transcendentals=0,
            bytes_accessed=out_bytes + row_bytes,    # pure-bandwidth op
        ),
    )(pos_flat)

    return out_flat.reshape(batch, n, f)


if __name__ == "__main__":
    key = jax.random.PRNGKey(0)

    # --- Test 1: module config Poslearned(w=4, h=4, features=32), batch=2 ---------
    w, h, features = 4, 4, 32
    batch = 2
    pos_embedding = jax.random.normal(key, (1, w * h, features), dtype=jnp.float32)

    # Force the Pallas path (the auto path would take the tiny-output fast path).
    out = poslearned_forward(pos_embedding, batch, force_pallas=True)
    out = jax.block_until_ready(out)
    ref = jnp.broadcast_to(pos_embedding, (batch, w * h, features))
    assert out.shape == (batch, w * h, features)
    assert jnp.allclose(out, ref)

    # Auto path (fast path for tiny outputs) must also be correct.
    out_auto = jax.block_until_ready(poslearned_forward(pos_embedding, batch))
    assert jnp.allclose(out_auto, ref)

    # --- Test 2: multi-block grid path (small shapes, tiny VMEM budget) ----------
    w2, h2, f2 = 4, 4, 128            # nf = 2048 (128-multiple)
    batch2 = 32
    pos2 = jax.random.normal(jax.random.PRNGKey(1), (1, w2 * h2, f2), dtype=jnp.float32)
    out2 = poslearned_forward(pos2, batch2, vmem_block_bytes=64 << 10,  # -> bt=8, 4 steps
                              force_pallas=True)
    out2 = jax.block_until_ready(out2)
    ref2 = jnp.broadcast_to(pos2, (batch2, w2 * h2, f2))
    assert out2.shape == (batch2, w2 * h2, f2)
    assert jnp.allclose(out2, ref2)

    print("KERNEL_OK")
</pallas_src>

<mosaic_0001>
module attributes {stable_mosaic.version = 11 : i64} {
  func.func @_broadcast_kernel(%arg0: i32, %arg1: memref<1x512xf32, #tpu.memory_space<vmem>>, %arg2: memref<2x512xf32, #tpu.memory_space<vmem>>) attributes {dimension_semantics = [#tpu.dimension_semantics<parallel>], iteration_bounds = array<i64: 1>, scalar_prefetch = 0 : i64, scratch_operands = 0 : i64, tpu.core_type = #tpu.core_type<tc>, window_params = [{pipeline_mode = #tpu.pipeline_mode<synchronous>, transform_indices = @transform_0, window_bounds = array<i64: 1, 512>}, {transform_indices = @transform_1, window_bounds = array<i64: 2, 512>}]} {
    %c0 = arith.constant 0 : index
    %c0_0 = arith.constant 0 : index
    %0 = vector.load %arg1[%c0, %c0_0] : memref<1x512xf32, #tpu.memory_space<vmem>>, vector<1x512xf32>
    %1 = vector.shape_cast %0 : vector<1x512xf32> to vector<1x512xf32>
    %2 = vector.broadcast %1 : vector<1x512xf32> to vector<2x512xf32>
    %c0_1 = arith.constant 0 : index
    %c0_2 = arith.constant 0 : index
    %3 = vector.load %arg2[%c0_1, %c0_2] : memref<2x512xf32, #tpu.memory_space<vmem>>, vector<2x512xf32>
    tpu.vector_store %arg2[%c0_1, %c0_2], %2 {strides = array<i32>} : memref<2x512xf32, #tpu.memory_space<vmem>>, vector<2x512xf32>,
    return
  }
  func.func @transform_0(%arg0: i32) -> (i32, i32) {
    %c0_i32 = arith.constant 0 : i32
    %c0_i32_0 = arith.constant 0 : i32
    %c0_i32_1 = arith.constant 0 : i32
    return %c0_i32, %c0_i32_0 : i32, i32
  }
  func.func @transform_1(%arg0: i32) -> (i32, i32) {
    %c0_i32 = arith.constant 0 : i32
    %c0_i32_0 = arith.constant 0 : i32
    return %arg0, %c0_i32 : i32, i32
  }
}

</mosaic_0001>

<bundles_post_ra>
// kernel: tpu_custom_call.1
= control target key start
LH: loop header
LB: loop body
LE: loop exit
PB: predicated region body
PF: predicated region fallthrough
CT: control target
= control target key end

     0   :  { %6 = vsyncpa [#allocation3], 0  ;;  %s129_s0 = inlined_call_operand.hbm [shape: f32[1,512], index: 0, kind: input, shape index: {}]   ;;  %s130_s1 = inlined_call_operand.hbm [shape: f32[2,512], index: 1, kind: output, shape index: {}]  }
   0x1   :  { %7 = vsyncpa [#allocation4], 0  ;;  %s13_s8 = sshll.u32 %s129_s0, 4  ;;  %s111_s9 = smov [#allocation2]   ;;  %s14_s8 = int_to_ptr.hbm [resolvable:$true] %s13_s8 }
   0x2   :  { %s15_s10 = sshll.u32 %s111_s9, 4  ;;  %s16_s10 = int_to_ptr.vmem [resolvable:$true] %s15_s10 }
   0x3   :  { %18 = dma.hbm_to_vmem [thread:$0]  %s14_s8, 64, %s16_s10, [#allocation3]  }
   0x4   :  { %107 = dma.done.wait [#allocation3], 64  }
   0x5   :  { %108 = vsyncadd [#allocation3], 4294967232  ;;  %v23_v0 = vld [vmem:[#allocation2] sm:$0xf]  ;;  %vm32_vm0 = vcmask 1041408   ;;  %vm34_vm1 = vcmask 1045508  }
   0x6   :  { %v25_v1 = vperm.slane %v23_v0, 0  ;;  %v26_v2 = vperm.slane %v23_v0, 1  ;;  %v27_v3 = vperm.slane %v23_v0, 2  ;;  %v28_v4 = vperm.slane %v23_v0, 3  ;;  %s112_s11 = smov [#allocation5]   ;;  %s47_s0 = sshll.u32 %s130_s1, 4  ;;  %s48_s0 = int_to_ptr.hbm [resolvable:$true] %s47_s0 }
   0x7   :  { %s45_s12 = sshll.u32 %s112_s11, 4  ;;  %vm36_vm2 = vcmask 1043456   ;;  %s46_s12 = int_to_ptr.vmem [resolvable:$true] %s45_s12 }
   0x8   :  { %v29_v5 = vrot.slane %v26_v2, 6  ;;  %v30_v6 = vrot.slane %v27_v3, 4  ;;  %v31_v7 = vrot.slane %v28_v4, 2 }
   0xa   :  { %v33_v8 = vsel %vm32_vm0, %v25_v1, %v29_v5  ;;  %v35_v9 = vsel %vm34_vm1, %v30_v6, %v31_v7 }
   0xb   :  { %v37_v10 = vsel %vm36_vm2, %v33_v8, %v35_v9 }
   0xc   :  { %39 = vst [vmem:[#allocation5] sm:$0xff] %v37_v10 }
   0xd   :  { %50 = dma.vmem_to_hbm [thread:$0]  %s46_s12, 128, %s48_s0, [#allocation4]  }
   0xe   :  { %109 = dma.done.wait [#allocation4], 128  }
   0xf   :  { %110 = vsyncadd [#allocation4], 4294967168 }
  0x10   :  { %55 = vsyncpa [#allocation3], 1 }
  0x11   :  { %56 = vsyncpa [#allocation4], 1 }

</bundles_post_ra>
